<compile_context>
chip_gen: v7x
topology: tpu7x:2x2x1
jax: 0.10.0
libtpu: 0.0.40
codegen_flags: <defaults>
</compile_context>

<pallas_src>
import jax
import jax.numpy as jnp
import numpy as np
from jax.experimental import pallas as pl
from jax.experimental.pallas import tpu as pltpu

TH_SIMILAR_MIN = 0.9
TH_DIFFERENT_MAX = 0.1
EPS = 1e-8
BIG = 1e30  # finite "infinity" for masked min/max (similarities are in [-1, 1])

EMB_DIM = 32
NUM_VEC = 64
MAX_BATCH_TILE = 128  # per-step batch tile (VMEM ~12-14 MiB at 128)


def _embedding_loss_kernel(emb_ref, lab_ref, out_ref):
    # emb_ref: (TB, 32, 64) native channels-first layout; lab_ref: (TB, 64) int32.
    e = emb_ref[...].astype(jnp.float32)                    # (TB, 32, 64)
    real_f = (lab_ref[...] == 1).astype(jnp.float32)        # (TB, 64), 1.0 = real

    # Normalize each 32-dim column vector in-place (sublane reduce + EUP rsqrt)
    # instead of dividing the 64x64 sim matrix.
    norm_sq = jnp.sum(e * e, axis=1, keepdims=True)          # (TB, 1, 64)
    inv_norm = jax.lax.rsqrt(jnp.maximum(norm_sq, EPS * EPS))
    en_cf = e * inv_norm                                     # (TB, 32, 64)

    # One minor-dim transpose for the LHS only; RHS stays channels-first, so the
    # batched MXU contraction is a plain (64,32)x(32,64) per batch.
    en_rows = jnp.transpose(en_cf, (0, 2, 1))                # (TB, 64, 32)
    sim = jnp.einsum('bnd,bdm->bnm', en_rows, en_cf,
                     preferred_element_type=jnp.float32)     # (TB, 64, 64), symmetric

    # Merged same-class / other-class reductions: 2 selects + 2 lane-axis
    # reductions replace the former 4+4.
    same = (real_f[:, :, None] == real_f[:, None, :])        # (TB, 64, 64)
    min_same = jnp.min(jnp.where(same, sim, BIG), axis=2)    # (TB, 64)
    max_other = jnp.max(jnp.where(same, -BIG, sim), axis=2)  # (TB, 64)

    nr = jnp.sum(real_f, axis=1, keepdims=True)              # (TB, 1)
    nf = NUM_VEC - nr
    nr_safe = jnp.maximum(nr, 1.0)
    nf_safe = jnp.maximum(nf, 1.0)
    # per-row weight: real rows averaged over nr, fake rows over nf
    w = real_f / nr_safe + (1.0 - real_f) / nf_safe          # (TB, 64)

    hinge = (jnp.maximum(TH_SIMILAR_MIN - min_same, 0.0)
             + jnp.maximum(max_other - TH_DIFFERENT_MAX, 0.0))
    per_batch = jnp.sum(hinge * w, axis=1, keepdims=True)    # (TB, 1)

    # A batch with no real or no fake vectors hits `continue` -> contributes 0.
    # This also gates garbage rows of the last partial embedding block
    # (their labels are padded zeros -> nr == 0).
    valid = jnp.logical_and(nr > 0.5, nf > 0.5)
    per_batch = jnp.where(valid, per_batch, 0.0)

    total = jnp.sum(per_batch)                               # scalar partial sum
    out_ref[...] = jnp.broadcast_to(total, out_ref.shape).astype(out_ref.dtype)


def embedding_loss(embeddings, length, label, *, batch_tile=MAX_BATCH_TILE):
    """embeddings: [B, 32, 64] (PyTorch layout), label: [B, 64] ints in {0,1}.
    `length` is unused (as in the PyTorch module)."""
    del length
    B, D, N = embeddings.shape
    assert D == EMB_DIM and N == NUM_VEC

    tb = max(1, min(batch_tile, B))
    # v7x megacore: for large batches keep >= 2 chunks so both TensorCores
    # receive grid steps via the "parallel" axis.
    if B >= 16 and pl.cdiv(B, tb) < 2:
        tb = pl.cdiv(B, 2)
    num_chunks = pl.cdiv(B, tb)
    b_pad = num_chunks * tb

    # Only the tiny label array is padded (zero labels -> padded/garbage tail
    # batches are gated to 0 in-kernel).  No wrapper pass over the embeddings.
    lab = label.astype(jnp.int32)
    if b_pad != B:
        lab = jnp.pad(lab, ((0, b_pad - B), (0, 0)))

    partial = pl.pallas_call(
        _embedding_loss_kernel,
        out_shape=jax.ShapeDtypeStruct((num_chunks, 8, 128), jnp.float32),
        grid_spec=pltpu.PrefetchScalarGridSpec(
            num_scalar_prefetch=0,
            grid=(num_chunks,),
            in_specs=[
                pl.BlockSpec((tb, EMB_DIM, NUM_VEC), lambda c: (c, 0, 0)),
                pl.BlockSpec((tb, NUM_VEC), lambda c: (c, 0)),
            ],
            out_specs=pl.BlockSpec((1, 8, 128), lambda c: (c, 0, 0)),
        ),
        compiler_params=pltpu.CompilerParams(
            dimension_semantics=("parallel",),
            vmem_limit_bytes=32 * 1024 * 1024),
    )(embeddings, lab)

    # each chunk's tile is filled with its scalar partial sum
    return jnp.sum(partial[:, 0, 0]) / B


def _reference_loss(embeddings, label):
    """Pure NumPy re-implementation of the PyTorch forward for verification."""
    embeddings = np.asarray(embeddings, dtype=np.float64)
    label = np.asarray(label)
    B = embeddings.shape[0]

    def cos(x1, x2):
        w1 = np.linalg.norm(x1, axis=1, keepdims=True)
        w2 = np.linalg.norm(x2, axis=1, keepdims=True)
        return (x1 @ x2.T) / np.maximum(w1 * w2.T, EPS)

    total = 0.0
    for b in range(B):
        e = embeddings[b]                      # (32, 64)
        lab = label[b]
        real_idx = np.where(lab == 1)[0]
        fake_idx = np.where(lab == 0)[0]
        if len(real_idx) == 0 or len(fake_idx) == 0:
            continue                           # matches `continue` (no contribution)
        r = e[:, real_idx].T                   # (Nr, 32)
        f = e[:, fake_idx].T                   # (Nf, 32)

        sim_f2f = cos(f, f)
        loss_f2f = np.maximum(TH_SIMILAR_MIN - sim_f2f.min(axis=1), 0.0).mean()
        sim_r2r = cos(r, r)
        loss_r2r = np.maximum(TH_SIMILAR_MIN - sim_r2r.min(axis=1), 0.0).mean()
        sim_f2r = cos(f, r)
        loss_f2r = np.maximum(sim_f2r.max(axis=1) - TH_DIFFERENT_MAX, 0.0).mean()
        loss_r2f = np.maximum(sim_f2r.max(axis=0) - TH_DIFFERENT_MAX, 0.0).mean()
        total += loss_f2f + loss_r2r + loss_f2r + loss_r2f
    return total / B


if __name__ == "__main__":
    key = jax.random.PRNGKey(0)
    k_emb, k_lab, k_emb2, k_lab2 = jax.random.split(key, 4)

    # --- small test matching the module (B=2, emb_dim=32, 64 vectors) ---
    B = 2
    embeddings = jax.random.normal(k_emb, (B, EMB_DIM, NUM_VEC), dtype=jnp.float32)
    label = jax.random.bernoulli(k_lab, 0.5, (B, NUM_VEC)).astype(jnp.int32)
    length = jnp.full((B,), NUM_VEC, dtype=jnp.int32)  # unused, signature parity

    loss = jax.block_until_ready(embedding_loss(embeddings, length, label))
    ref = _reference_loss(np.asarray(embeddings), np.asarray(label))
    assert np.allclose(float(loss), ref, atol=5e-5, rtol=5e-5), (float(loss), ref)

    # --- multi-chunk path: label-only padding, several grid steps, partial
    #     last embedding block, and the empty-class ("continue") gate ---
    B2 = 5
    embeddings2 = jax.random.normal(k_emb2, (B2, EMB_DIM, NUM_VEC), dtype=jnp.float32)
    label2 = jax.random.bernoulli(k_lab2, 0.5, (B2, NUM_VEC)).astype(jnp.int32)
    label2 = label2.at[3].set(0)               # batch 3: all fake -> contributes 0
    length2 = jnp.full((B2,), NUM_VEC, dtype=jnp.int32)

    loss2 = jax.block_until_ready(
        embedding_loss(embeddings2, length2, label2, batch_tile=2))
    ref2 = _reference_loss(np.asarray(embeddings2), np.asarray(label2))
    assert np.allclose(float(loss2), ref2, atol=5e-5, rtol=5e-5), (float(loss2), ref2)

    print("KERNEL_OK")
</pallas_src>

<mosaic_0001>
module attributes {stable_mosaic.version = 11 : i64} {
  func.func @_embedding_loss_kernel(%arg0: i32, %arg1: memref<2x32x64xf32, #tpu.memory_space<vmem>>, %arg2: memref<2x64xi32, #tpu.memory_space<vmem>>, %arg3: memref<1x8x128xf32, #tpu.memory_space<vmem>>) attributes {dimension_semantics = [#tpu.dimension_semantics<parallel>], iteration_bounds = array<i64: 1>, scalar_prefetch = 0 : i64, scratch_operands = 0 : i64, tpu.core_type = #tpu.core_type<tc>, window_params = [{transform_indices = @transform_0, window_bounds = array<i64: 2, 32, 64>}, {transform_indices = @transform_1, window_bounds = array<i64: 2, 64>}, {transform_indices = @transform_2, window_bounds = array<i64: 1, 8, 128>}]} {
    %c0 = arith.constant 0 : index
    %c0_0 = arith.constant 0 : index
    %c0_1 = arith.constant 0 : index
    %0 = vector.load %arg1[%c0, %c0_0, %c0_1] : memref<2x32x64xf32, #tpu.memory_space<vmem>>, vector<2x32x64xf32>
    %c0_2 = arith.constant 0 : index
    %c0_3 = arith.constant 0 : index
    %1 = vector.load %arg2[%c0_2, %c0_3] : memref<2x64xi32, #tpu.memory_space<vmem>>, vector<2x64xi32>
    %c1_i32 = arith.constant 1 : i32
    %2 = vector.broadcast %c1_i32 : i32 to vector<2x64xi32>
    %3 = arith.cmpi eq, %1, %2 : vector<2x64xi32>
    %4 = arith.extui %3 : vector<2x64xi1> to vector<2x64xi32>
    %5 = arith.sitofp %4 : vector<2x64xi32> to vector<2x64xf32>
    %6 = arith.mulf %0, %0 : vector<2x32x64xf32>
    %cst = arith.constant dense<0.000000e+00> : vector<2x64xf32>
    %7 = vector.multi_reduction <add>, %6, %cst [1] : vector<2x32x64xf32> to vector<2x64xf32>
    %8 = vector.shape_cast %7 : vector<2x64xf32> to vector<2x1x64xf32>
    %cst_4 = arith.constant 1.000000e-16 : f32
    %9 = vector.broadcast %cst_4 : f32 to vector<2x1x64xf32>
    %10 = arith.maximumf %8, %9 : vector<2x1x64xf32>
    %11 = math.rsqrt %10 : vector<2x1x64xf32>
    %12 = vector.broadcast %11 : vector<2x1x64xf32> to vector<2x32x64xf32>
    %13 = arith.mulf %0, %12 : vector<2x32x64xf32>
    %14 = tpu.transpose %13, [0, 2, 1] : vector<2x32x64xf32> -> vector<2x64x32xf32>
    "tpu.trace_start"() <{level = 10 : i32, message = "bnd,bdm->bnm"}> : () -> ()
    %cst_5 = arith.constant dense<0.000000e+00> : vector<2x64x64xf32>
    %15 = tpu.matmul %14, %13, %cst_5 {dimension_numbers = #tpu.dot_dimension_numbers<[2], [1], [1], [2], [0, 0, 0, 1, 1, 2], [0], [0]>} : vector<2x64x32xf32>, vector<2x32x64xf32>, vector<2x64x64xf32> -> vector<2x64x64xf32>
    "tpu.trace_stop"() : () -> ()
    %16 = vector.shape_cast %5 : vector<2x64xf32> to vector<2x64x1xf32>
    %17 = vector.shape_cast %5 : vector<2x64xf32> to vector<2x1x64xf32>
    %18 = vector.broadcast %16 : vector<2x64x1xf32> to vector<2x64x64xf32>
    %19 = vector.broadcast %17 : vector<2x1x64xf32> to vector<2x64x64xf32>
    %20 = arith.cmpf oeq, %18, %19 : vector<2x64x64xf32>
    %cst_6 = arith.constant 1.000000e+30 : f32
    %21 = vector.broadcast %cst_6 : f32 to vector<2x64x64xf32>
    %22 = arith.select %20, %15, %21 : vector<2x64x64xi1>, vector<2x64x64xf32>
    %cst_7 = arith.constant dense<0x7F800000> : vector<2x64xf32>
    %23 = vector.multi_reduction <minimumf>, %22, %cst_7 [2] : vector<2x64x64xf32> to vector<2x64xf32>
    %cst_8 = arith.constant -1.000000e+30 : f32
    %24 = vector.broadcast %cst_8 : f32 to vector<2x64x64xf32>
    %25 = arith.select %20, %24, %15 : vector<2x64x64xi1>, vector<2x64x64xf32>
    %cst_9 = arith.constant dense<0xFF800000> : vector<2x64xf32>
    %26 = vector.multi_reduction <maximumf>, %25, %cst_9 [2] : vector<2x64x64xf32> to vector<2x64xf32>
    %cst_10 = arith.constant dense<0.000000e+00> : vector<2xf32>
    %27 = vector.multi_reduction <add>, %5, %cst_10 [1] : vector<2x64xf32> to vector<2xf32>
    %28 = vector.shape_cast %27 : vector<2xf32> to vector<2x1xf32>
    %cst_11 = arith.constant 6.400000e+01 : f32
    %29 = vector.broadcast %cst_11 : f32 to vector<2x1xf32>
    %30 = arith.subf %29, %28 : vector<2x1xf32>
    %cst_12 = arith.constant 1.000000e+00 : f32
    %31 = vector.broadcast %cst_12 : f32 to vector<2x1xf32>
    %32 = arith.maximumf %28, %31 : vector<2x1xf32>
    %cst_13 = arith.constant 1.000000e+00 : f32
    %33 = vector.broadcast %cst_13 : f32 to vector<2x1xf32>
    %34 = arith.maximumf %30, %33 : vector<2x1xf32>
    %35 = vector.broadcast %32 : vector<2x1xf32> to vector<2x64xf32>
    %36 = arith.divf %5, %35 : vector<2x64xf32>
    %cst_14 = arith.constant 1.000000e+00 : f32
    %37 = vector.broadcast %cst_14 : f32 to vector<2x64xf32>
    %38 = arith.subf %37, %5 : vector<2x64xf32>
    %39 = vector.broadcast %34 : vector<2x1xf32> to vector<2x64xf32>
    %40 = arith.divf %38, %39 : vector<2x64xf32>
    %41 = arith.addf %36, %40 : vector<2x64xf32>
    %cst_15 = arith.constant 0.899999976 : f32
    %42 = vector.broadcast %cst_15 : f32 to vector<2x64xf32>
    %43 = arith.subf %42, %23 : vector<2x64xf32>
    %cst_16 = arith.constant 0.000000e+00 : f32
    %44 = vector.broadcast %cst_16 : f32 to vector<2x64xf32>
    %45 = arith.maximumf %43, %44 : vector<2x64xf32>
    %cst_17 = arith.constant 1.000000e-01 : f32
    %46 = vector.broadcast %cst_17 : f32 to vector<2x64xf32>
    %47 = arith.subf %26, %46 : vector<2x64xf32>
    %cst_18 = arith.constant 0.000000e+00 : f32
    %48 = vector.broadcast %cst_18 : f32 to vector<2x64xf32>
    %49 = arith.maximumf %47, %48 : vector<2x64xf32>
    %50 = arith.addf %45, %49 : vector<2x64xf32>
    %51 = arith.mulf %50, %41 : vector<2x64xf32>
    %cst_19 = arith.constant dense<0.000000e+00> : vector<2xf32>
    %52 = vector.multi_reduction <add>, %51, %cst_19 [1] : vector<2x64xf32> to vector<2xf32>
    %53 = vector.shape_cast %52 : vector<2xf32> to vector<2x1xf32>
    %cst_20 = arith.constant 5.000000e-01 : f32
    %54 = vector.broadcast %cst_20 : f32 to vector<2x1xf32>
    %55 = arith.cmpf ogt, %28, %54 : vector<2x1xf32>
    %cst_21 = arith.constant 5.000000e-01 : f32
    %56 = vector.broadcast %cst_21 : f32 to vector<2x1xf32>
    %57 = arith.cmpf ogt, %30, %56 : vector<2x1xf32>
    %58 = arith.andi %55, %57 : vector<2x1xi1>
    %cst_22 = arith.constant 0.000000e+00 : f32
    %59 = vector.broadcast %cst_22 : f32 to vector<2x1xf32>
    %60 = arith.select %58, %53, %59 : vector<2x1xi1>, vector<2x1xf32>
    %61 = vector.shape_cast %60 : vector<2x1xf32> to vector<1x2x1xf32>
    %cst_23 = arith.constant dense<0.000000e+00> : vector<1xf32>
    %62 = vector.multi_reduction <add>, %61, %cst_23 [1, 2] : vector<1x2x1xf32> to vector<1xf32>
    %63 = vector.shape_cast %62 : vector<1xf32> to vector<1x1x1xf32>
    %64 = vector.extract %63[0, 0, 0] : f32 from vector<1x1x1xf32>
    %65 = vector.broadcast %64 : f32 to vector<1x8x128xf32>
    %c0_24 = arith.constant 0 : index
    %c0_25 = arith.constant 0 : index
    %c0_26 = arith.constant 0 : index
    %66 = vector.load %arg3[%c0_24, %c0_25, %c0_26] : memref<1x8x128xf32, #tpu.memory_space<vmem>>, vector<1x8x128xf32>
    tpu.vector_store %arg3[%c0_24, %c0_25, %c0_26], %65 {strides = array<i32>} : memref<1x8x128xf32, #tpu.memory_space<vmem>>, vector<1x8x128xf32>,
    return
  }
  func.func @transform_0(%arg0: i32) -> (i32, i32, i32) {
    %c0_i32 = arith.constant 0 : i32
    %c0_i32_0 = arith.constant 0 : i32
    %c0_i32_1 = arith.constant 0 : i32
    return %arg0, %c0_i32, %c0_i32_0 : i32, i32, i32
  }
  func.func @transform_1(%arg0: i32) -> (i32, i32) {
    %c0_i32 = arith.constant 0 : i32
    %c0_i32_0 = arith.constant 0 : i32
    return %arg0, %c0_i32 : i32, i32
  }
  func.func @transform_2(%arg0: i32) -> (i32, i32, i32) {
    %c0_i32 = arith.constant 0 : i32
    %c0_i32_0 = arith.constant 0 : i32
    %c0_i32_1 = arith.constant 0 : i32
    return %arg0, %c0_i32, %c0_i32_0 : i32, i32, i32
  }
}

</mosaic_0001>

<bundles_post_ra>
// kernel: tpu_custom_call.1
= control target key start
LH: loop header
LB: loop body
LE: loop exit
PB: predicated region body
PF: predicated region fallthrough
CT: control target
= control target key end

     0   :  { %7 = vsyncpa [#allocation3], 0  ;;  %s1516_s0 = inlined_call_operand.hbm [shape: f32[2,32,64], index: 0, kind: input, shape index: {}]   ;;  %s1517_s1 = inlined_call_operand.vmem [shape: s32[2,64], index: 1, kind: input, shape index: {}]   ;;  %s1518_s2 = inlined_call_operand.hbm [shape: f32[1,8,128], index: 2, kind: output, shape index: {}]  }
   0x1   :  { %8 = vsyncpa [#allocation4], 0  ;;  %s1227_s9 = smov [#allocation2]   ;;  %s1179_s13 = scalar_lea.hbm %s1516_s0, 1024 }
   0x2   :  { %s14_s10 = sshll.u32 %s1227_s9, 4  ;;  %p1180_p0 = scmp.ne.s32.totalorder %s1516_s0, %s1179_s13  ;;  %s15_s10 = int_to_ptr.vmem [resolvable:$true] %s14_s10 }
   0x3   :  { %p1183_p1 = scmp.lt.u32.totalorder %s1179_s13, %s1516_s0 }
   0x5   :  { %p1185_p2 = pnand %p1183_p1, %p1180_p0 }
   0x7   :  { %1188 = shalt.err (!%p1185_p2)
}
   0x8   :  { %s1189_s18 = scalar_lea.vmem %s15_s10, 1024  ;;  %p1194_p4 = scmp.lt.s32.totalorder %s15_s10, %s15_s10 }
   0x9   :  { %p1190_p3 = scmp.ne.s32.totalorder %s15_s10, %s1189_s18  ;;  %p1195_p5 = scmp.lt.s32.totalorder %s1189_s18, %s1189_s18 }
   0xb   :  { %p1196_p6 = por %p1195_p5, %p1194_p4 }
   0xd   :  { %p1197_p7 = pnand %p1196_p6, %p1190_p3 }
   0xf   :  { %1200 = shalt.err (!%p1197_p7)
}
  0x10   :  { %s1228_s19 = smov 128   ;;  %s1229_s20 = smov 8  }
  0x11   :  { %20 = dma.hbm_to_vmem [thread:$0]  %s1516_s0, 1024, %s15_s10, [#allocation3], %s1228_s19, %s1228_s19, %s1229_s20  }
  0x12   :  { %1223 = dma.done.wait [#allocation3], 1024  }
  0x13   :  { %1224 = vsyncadd [#allocation3], 4294966272  ;;  %v30_v0 = vld [vmem:[#allocation2 + $0x20] sm:$0xff]  ;;  %v31_v1 = vld [vmem:[#allocation2 + $0x28] sm:$0xff]  ;;  %vm46_vm0 = vcmask 523264   ;;  %v408_v58 = vlaneseq  ;;  %v1230_v62 = vmov 0.0  }
  0x14   :  { %v32_v2 = vld [vmem:[#allocation2 + $0x30] sm:$0xff]  ;;  %v33_v3 = vld [vmem:[#allocation2 + $0x38] sm:$0xff]  ;;  %v42_v4 = vmul.f32 %v30_v0, %v30_v0  ;;  %v43_v5 = vmul.f32 %v31_v1, %v31_v1  ;;  %v26_v7 = vld [vmem:[#allocation2] sm:$0xff]  ;;  %vm655_vm2 = vcmask 517120   ;;  %vm149_vm3 = vcmask 261120  }
  0x15   :  { %v44_v6 = vmul.f32 %v32_v2, %v32_v2  ;;  %v27_v8 = vld [vmem:[#allocation2 + $0x8] sm:$0xff]  ;;  %v45_v9 = vmul.f32 %v33_v3, %v33_v3  ;;  %v28_v10 = vld [vmem:[#allocation2 + $0x10] sm:$0xff]  ;;  %v29_v11 = vld [vmem:[#allocation2 + $0x18] sm:$0xff]  ;;  %v38_v12 = vmul.f32 %v26_v7, %v26_v7  ;;  %v1270_v59 = vshrl.u32 %v408_v58, 7 }
  0x16   :  { %v39_v13 = vmul.f32 %v27_v8, %v27_v8  ;;  %v60_v14 = vsel %vm46_vm0, %v42_v4, 0.0  ;;  %v61_v15 = vsel %vm46_vm0, %v43_v5, 0.0  ;;  %v40_v17 = vmul.f32 %v28_v10, %v28_v10  ;;  %v34_v60 = vld [vmem:[%s1517_s1] sm:$0x3]  ;;  %s1233_s1 = smov [#allocation5]  }
  0x17   :  { %v63_v16 = vsel %vm46_vm0, %v44_v6, 0.0  ;;  %v62_v18 = vadd.f32 %v61_v15, %v60_v14  ;;  %v41_v19 = vmul.f32 %v29_v11, %v29_v11  ;;  %v47_v20 = vsel %vm46_vm0, %v38_v12, 0.0  ;;  %s1038_s24 = sshll.u32 %s1233_s1, 4  ;;  %s1039_s24 = int_to_ptr.vmem [resolvable:$true] %s1038_s24 }
  0x18   :  { %v65_v21 = vsel %vm46_vm0, %v45_v9, 0.0  ;;  %v48_v22 = vsel %vm46_vm0, %v39_v13, 0.0  ;;  %v50_v23 = vsel %vm46_vm0, %v40_v17, 0.0  ;;  %vm35_vm1 = vcmp.eq.s32.totalorder %v34_v60, 1  ;;  %s1201_s26 = scalar_lea.vmem %s1039_s24, 128  ;;  %p1206_p9 = scmp.lt.s32.totalorder %s1039_s24, %s1039_s24 }
  0x19   :  { %v64_v24 = vadd.f32 %v63_v16, %v62_v18  ;;  %v49_v25 = vadd.f32 %v48_v22, %v47_v20  ;;  %v52_v26 = vsel %vm46_vm0, %v41_v19, 0.0  ;;  %v1276_v61 = vsub.s32 0, %v1270_v59  ;;  %p1202_p8 = scmp.ne.s32.totalorder %s1039_s24, %s1201_s26  ;;  %p1207_p10 = scmp.lt.s32.totalorder %s1201_s26, %s1201_s26 }
  0x1a   :  { %v1278_v63 = vsel %vm35_vm1, 1.0, %v1230_v62 }
  0x1b   :  { %v66_v27 = vadd.f32 %v65_v21, %v64_v24  ;;  %v51_v28 = vadd.f32 %v50_v23, %v49_v25  ;;  %v664_v25 = vsub.f32 1.0, %v1278_v63  ;;  %p1208_p11 = por %p1207_p10, %p1206_p9 }
  0x1d   :  { %v67_v29 = vrot.slane %v66_v27, 4  ;;  %v53_v30 = vadd.f32 %v52_v26, %v51_v28  ;;  %p1209_p12 = pnand %p1208_p11, %p1202_p8 }
  0x1f   :  { %v68_v31 = vadd.f32 %v67_v29, %v66_v27  ;;  %v54_v32 = vrot.slane %v53_v30, 4 }
  0x21   :  { %v69_v33 = vrot.slane %v68_v31, 2  ;;  %v55_v34 = vadd.f32 %v54_v32, %v53_v30 }
  0x23   :  { %v70_v35 = vadd.f32 %v69_v33, %v68_v31  ;;  %v56_v36 = vrot.slane %v55_v34, 2 }
  0x25   :  { %v71_v37 = vrot.slane %v70_v35, 1  ;;  %v57_v38 = vadd.f32 %v56_v36, %v55_v34 }
  0x27   :  { %v72_v39 = vadd.f32 %v71_v37, %v70_v35  ;;  %v58_v40 = vrot.slane %v57_v38, 1  ;;  %v1231_v35 = vmov 1966171168  }
  0x28   :  { %v480_v36 = vunpack.c.l.s4 %v1231_v35 }
  0x29   :  { %v74_v41 = vmax.f32 %v72_v39, 1e-16  ;;  %v59_v42 = vadd.f32 %v58_v40, %v57_v38 }
  0x2a   :  { %v481_v38 = vunpack.c.0.s8 %v480_v36 }
  0x2b   :  { %1171 = vrsqrt.f32 %v74_v41  ;;  %v73_v43 = vmax.f32 %v59_v42, 1e-16 }
  0x2c   :  { %v484_v40 = vsub.s32 %v481_v38, %v1270_v59 }
  0x2d   :  { %1173 = vrsqrt.f32 %v73_v43 }
  0x2e   :  { %v485_v41 = vrot.slane %v1278_v63, %v484_v40 }
  0x30   :  { %v486_v43 = vcombine.high %v485_v41, %v485_v41 }
  0x35   :  { %v1172_v44 = vpop.eup %1171 }
  0x36   :  { %v81_v45 = vmul.f32 %v1172_v44, %v30_v0  ;;  %v82_v47 = vmul.f32 %v1172_v44, %v31_v1  ;;  %v83_v50 = vmul.f32 %v1172_v44, %v32_v2  ;;  %v84_v52 = vmul.f32 %v1172_v44, %v33_v3 }
  0x37   :  { %v1174_v46 = vpop.eup %1173  ;;  %v411_v0 = vrot.slane %v1278_v63, %v1276_v61  ;;  %v445_v1 = vsub.s32 1, %v1270_v59  ;;  %v656_v3 = vsel %vm655_vm2, %v1278_v63, 0.0  ;;  %v500_v44 = vrot.slane %v486_v43, %v484_v40 }
  0x38   :  { %117 = vxpose.xlu1.b32.start [1/4] (short) (narrow) %v81_v45, 64  ;;  %v77_v48 = vmul.f32 %v1174_v46, %v26_v7  ;;  %v78_v49 = vmul.f32 %v1174_v46, %v27_v8  ;;  %v79_v51 = vmul.f32 %v1174_v46, %v28_v10  ;;  %v80_v53 = vmul.f32 %v1174_v46, %v29_v11 }
  0x39   :  { %v1152_v54 = vpack.c.bf16 %v82_v47, %v81_v45  ;;  %v1156_v56 = vpack.c.bf16 %v84_v52, %v83_v50  ;;  %v446_v2 = vrot.slane %v1278_v63, %v445_v1  ;;  %v493_v46 = vrot.slane %v485_v41, %v484_v40 }
  0x3a   :  { %85 = vxpose.xlu0.b32.start [1/4] (short) (narrow) %v77_v48, 64  ;;  %v1144_v55 = vpack.c.bf16 %v78_v49, %v77_v48  ;;  %v1148_v57 = vpack.c.bf16 %v80_v53, %v79_v51 }
  0x3b   :  { %1153 = vmatprep.subr.bf16.mxu1 %v1152_v54  ;;  %v1342_v48 = vrot.slane %v493_v46, %v1276_v61 }
  0x3c   :  { %118 = vxpose.xlu1.b32.cont [2/4] (short) (narrow) %v82_v47, 64  ;;  %1145 = vmatprep.subr.bf16.mxu0 %v1144_v55  ;;  %v1338_v47 = vrot.slane %v500_v44, %v1276_v61 }
  0x3d   :  { %1147 = vmatpush3.bf16.msra.mxu0 %v1144_v55  ;;  %1155 = vmatpush3.bf16.msra.mxu1 %v1152_v54 }
  0x3e   :  { %86 = vxpose.xlu0.b32.cont [2/4] (short) (narrow) %v78_v49, 64  ;;  %1149 = vmatprep.subr.bf16.mxu0 %v1148_v57 }
  0x3f   :  { %1157 = vmatprep.subr.bf16.mxu1 %v1156_v56 }
  0x40   :  { %119 = vxpose.xlu1.b32.cont [3/4] (short) (narrow) %v83_v50, 64 }
  0x41   :  { %1151 = vmatpush3.bf16.msra.mxu0 %v1148_v57  ;;  %1159 = vmatpush3.bf16.msra.mxu1 %v1156_v56 }
  0x42   :  { %87 = vxpose.xlu0.b32.cont [3/4] (short) (narrow) %v79_v51, 64 }
  0x44   :  { %120 = vxpose.xlu1.b32.end [4/4] (short) (narrow) %v84_v52, 64 }
  0x46   :  { %88 = vxpose.xlu0.b32.end [4/4] (short) (narrow) %v80_v53, 64 }
  0x72   :  { %413 = vbcast.lane.b32.xlu1 %v411_v0, 256 }
  0x76   :  { %417 = vbcast.lane.b32.xlu1 %v411_v0, 264 }
  0x7a   :  { %448 = vbcast.lane.b32.xlu1 %v446_v2, 256 }
  0x7e   :  { %452 = vbcast.lane.b32.xlu1 %v446_v2, 264 }
  0x82   :  { %421 = vbcast.lane.b32.xlu1 %v411_v0, 272 }
  0x83   :  { %657 = vadd.xlane.f32.xlu0 %v656_v3 }
  0x86   :  { %425 = vbcast.lane.b32.xlu1 %v411_v0, 280 }
  0x8a   :  { %460 = vbcast.lane.b32.xlu1 %v446_v2, 280 }
  0x8e   :  { %429 = vbcast.lane.b32.xlu1 %v411_v0, 288 }
  0x92   :  { %464 = vbcast.lane.b32.xlu1 %v446_v2, 288 }
  0x96   :  { %433 = vbcast.lane.b32.xlu1 %v411_v0, 296 }
  0x99   :  { %456 = vbcast.lane.b32.xlu0 %v446_v2, 272 }
  0x9a   :  { %468 = vbcast.lane.b32.xlu1 %v446_v2, 296 }
  0x9d   :  { %437 = vbcast.lane.b32.xlu0 %v411_v0, 304 }
  0x9e   :  { %472 = vbcast.lane.b32.xlu1 %v446_v2, 304 }
  0xa1   :  { %441 = vbcast.lane.b32.xlu0 %v411_v0, 312 }
  0xa2   :  { %476 = vbcast.lane.b32.xlu1 %v446_v2, 312 }
  0xb8   :  { %v133_v4 = vpop.trf.xlu1 }
  0xb9   :  { %1132 = vmatprep.mubr.msk.f32.mxu1 %vm149_vm3, %v133_v4 }
  0xba   :  { %v101_v5 = vpop.trf.xlu0 }
  0xbb   :  { %1112 = vmatprep.mubr.msk.f32.mxu0 %vm149_vm3, %v101_v5 }
  0xbc   :  { %v134_v6 = vpop.trf.xlu1 }
  0xbd   :  { %1133 = vmatmul.mubr.msk.f32.vlgmr.msra.gmra.mrb[0].mxu1 %vm149_vm3, %v134_v6 }
  0xbe   :  { %v102_v7 = vpop.trf.xlu0 }
  0xbf   :  { %1113 = vmatmul.mubr.msk.f32.vlgmr.msra.gmra.mrb[0].mxu0 %vm149_vm3, %v102_v7 }
  0xc0   :  { %v135_v8 = vpop.trf.xlu1 }
  0xc1   :  { %1135 = vmatprep.mubr.msk.f32.mxu1 %vm149_vm3, %v135_v8 }
  0xc2   :  { %v103_v9 = vpop.trf.xlu0 }
  0xc3   :  { %1115 = vmatprep.mubr.msk.f32.mxu0 %vm149_vm3, %v103_v9 }
  0xc4   :  { %v136_v10 = vpop.trf.xlu1 }
  0xc5   :  { %1136 = vmatmul.mubr.msk.f32.gmra.mrb[2].mxu1 %vm149_vm3, %v136_v10 }
  0xc6   :  { %v104_v11 = vpop.trf.xlu0 }
  0xc7   :  { %1116 = vmatmul.mubr.msk.f32.gmra.mrb[2].mxu0 %vm149_vm3, %v104_v11 }
  0xc8   :  { %v137_v12 = vpop.trf.xlu1 }
  0xc9   :  { %1138 = vmatprep.mubr.msk.f32.mxu1 %vm149_vm3, %v137_v12 }
  0xca   :  { %v105_v13 = vpop.trf.xlu0 }
  0xcb   :  { %1118 = vmatprep.mubr.msk.f32.mxu0 %vm149_vm3, %v105_v13 }
  0xcc   :  { %v138_v14 = vpop.trf.xlu1 }
  0xcd   :  { %1139 = vmatmul.mubr.msk.f32.gmra.mrb[4].mxu1 %vm149_vm3, %v138_v14 }
  0xce   :  { %v106_v15 = vpop.trf.xlu0 }
  0xcf   :  { %1119 = vmatmul.mubr.msk.f32.gmra.mrb[4].mxu0 %vm149_vm3, %v106_v15 }
  0xd0   :  { %v139_v16 = vpop.trf.xlu1 }
  0xd1   :  { %1141 = vmatprep.mubr.msk.f32.mxu1 %vm149_vm3, %v139_v16 }
  0xd2   :  { %v107_v17 = vpop.trf.xlu0 }
  0xd3   :  { %1121 = vmatprep.mubr.msk.f32.mxu0 %vm149_vm3, %v107_v17 }
  0xd4   :  { %v140_v18 = vpop.trf.xlu1 }
  0xd5   :  { %1142 = vmatmul.mubr.msk.f32.gmra.mrb[6].mxu1 %vm149_vm3, %v140_v18 }
  0xd6   :  { %v108_v19 = vpop.trf.xlu0 }
  0xd7   :  { %1122 = vmatmul.mubr.msk.f32.gmra.mrb[6].mxu0 %vm149_vm3, %v108_v19 }
  0xe4   :  { %v414_v33 = vpop.permute.xlu1 %413 }
  0xe5   :  { %vm511_vm9 = vcmp.eq.f32.partialorder %v414_v33, %v1342_v48 }
  0xe8   :  { %v418_v34 = vpop.permute.xlu1 %417 }
  0xe9   :  { %vm512_vm8 = vcmp.eq.f32.partialorder %v418_v34, %v1342_v48 }
  0xec   :  { %v449_v37 = vpop.permute.xlu1 %448 }
  0xed   :  { %vm519_vm10 = vcmp.eq.f32.partialorder %v449_v37, %v1338_v47 }
  0xf0   :  { %v453_v39 = vpop.permute.xlu1 %452 }
  0xf1   :  { %vm520_vm7 = vcmp.eq.f32.partialorder %v453_v39, %v1338_v47 }
  0xf4   :  { %v1333_v42 = vpop.permute.xlu1 %421 }
  0xf5   :  { %vm513_vm14 = vcmp.eq.f32.partialorder %v1333_v42, %v1342_v48 }
  0xf8   :  { %v1335_v45 = vpop.permute.xlu1 %425 }
  0xf9   :  { %vm514_vm12 = vcmp.eq.f32.partialorder %v1335_v45, %v1342_v48 }
  0xfc   :  { %v461_v49 = vpop.permute.xlu1 %460 }
  0xfd   :  { %vm522_vm11 = vcmp.eq.f32.partialorder %v461_v49, %v1338_v47  ;;  %v1232_v49 = vmov 0  }
  0xfe   :  { %1169 = vset.pattern.permute.xlu1 %v1232_v49  ;;  %1170 = vset.pattern.permute.xlu0 %v1232_v49 }
 0x110   :  { %v658_v20 = vpop.xlane.xlu0 %657 }
 0x111   :  { %v659_v21 = vsub.f32 64.0, %v658_v20  ;;  %v660_v22 = vmax.f32 %v658_v20, 1.0  ;;  %vm1015_vm4 = vcmp.gt.f32.partialorder %v658_v20, 0.5 }
 0x113   :  { %v661_v23 = vmax.f32 %v659_v21, 1.0  ;;  %1175 = vrcp.f32 %v660_v22  ;;  %vm1016_vm5 = vcmp.gt.f32.partialorder %v659_v21, 0.5 }
 0x114   :  { %vm1304_vm6 = vmand %vm1015_vm4, %vm1016_vm5  ;;  %v457_v12 = vpop.permute.xlu0 %456 }
 0x115   :  { %1177 = vrcp.f32 %v661_v23  ;;  %vm521_vm13 = vcmp.eq.f32.partialorder %v457_v12, %v1338_v47 }
 0x11d   :  { %v1176_v26 = vpop.eup %1175 }
 0x11e   :  { %v663_v27 = vmul.f32 %v1176_v26, %v1278_v63 }
 0x11f   :  { %v1178_v28 = vpop.eup %1177 }
 0x120   :  { %v666_v29 = vmul.f32 %v1178_v28, %v664_v25 }
 0x122   :  { %v667_v30 = vadd.f32 %v666_v29, %v663_v27 }
 0x124   :  { %v1311_v31 = vrot.slane %v667_v30, %v1276_v61  ;;  %v1315_v32 = vrot.slane %v667_v30, %v445_v1  ;;  %v1352_v61 = vpop.permute.xlu1 %429 }
 0x125   :  { %vm515_vm4 = vcmp.eq.f32.partialorder %v1352_v61, %v1342_v48 }
 0x126   :  { %758 = vbcast.lane.b32.xlu1 %v1311_v31, 264  ;;  %754 = vbcast.lane.b32.xlu0 %v1311_v31, 256 }
 0x128   :  { %v1363_v7 = vpop.permute.xlu1 %464 }
 0x129   :  { %vm523_vm3 = vcmp.eq.f32.partialorder %v1363_v7, %v1338_v47 }
 0x12a   :  { %789 = vbcast.lane.b32.xlu1 %v1315_v32, 256  ;;  %762 = vbcast.lane.b32.xlu0 %v1311_v31, 272 }
 0x12c   :  { %v434_v18 = vpop.permute.xlu1 %433 }
 0x12d   :  { %vm516_vm1 = vcmp.eq.f32.partialorder %v434_v18, %v1342_v48 }
 0x12e   :  { %793 = vbcast.lane.b32.xlu1 %v1315_v32, 264  ;;  %766 = vbcast.lane.b32.xlu0 %v1311_v31, 280 }
 0x130   :  { %v469_v29 = vpop.permute.xlu1 %468 }
 0x131   :  { %vm524_vm15 = vcmp.eq.f32.partialorder %v469_v29, %v1338_v47 }
 0x132   :  { %797 = vbcast.lane.b32.xlu1 %v1315_v32, 272  ;;  %770 = vbcast.lane.b32.xlu0 %v1311_v31, 288 }
 0x136   :  { %801 = vbcast.lane.b32.xlu1 %v1315_v32, 280  ;;  %774 = vbcast.lane.b32.xlu0 %v1311_v31, 296 }
 0x13a   :  { %805 = vbcast.lane.b32.xlu1 %v1315_v32, 288  ;;  %778 = vbcast.lane.b32.xlu0 %v1311_v31, 304 }
 0x13e   :  { %809 = vbcast.lane.b32.xlu1 %v1315_v32, 296 }
 0x142   :  { %813 = vbcast.lane.b32.xlu1 %v1315_v32, 304 }
 0x190   :  { %v1134_v50 = vpop.f32.mrb[0].mxu1 }
 0x191   :  { %v369_v51 = vpop.f32.mrb[1].mxu1  ;;  %v536_v52 = vsel %vm520_vm7, %v1134_v50, 1e+30  ;;  %v600_v3 = vsel %vm520_vm7, -1e+30, %v1134_v50  ;;  %v473_v50 = vpop.permute.xlu1 %472 }
 0x192   :  { %v1114_v53 = vpop.f32.mrb[0].mxu0  ;;  %v570_v54 = vsel %vm46_vm0, %v536_v52, inf  ;;  %v535_v0 = vsel %vm519_vm10, %v369_v51, 1e+30  ;;  %v634_v11 = vsel %vm46_vm0, %v600_v3, -inf }
 0x193   :  { %v240_v55 = vpop.f32.mrb[1].mxu0  ;;  %571 = vmin.xlane.f32.xlu0 %v570_v54  ;;  %v528_v56 = vsel %vm512_vm8, %v1114_v53, 1e+30  ;;  %v592_v62 = vsel %vm512_vm8, -1e+30, %v1114_v53  ;;  %v567_v5 = vsel %vm46_vm0, %v535_v0, inf  ;;  %vm525_vm8 = vcmp.eq.f32.partialorder %v473_v50, %v1338_v47 }
 0x194   :  { %v546_v57 = vsel %vm46_vm0, %v528_v56, inf  ;;  %v527_v60 = vsel %vm511_vm9, %v240_v55, 1e+30  ;;  %v610_v1 = vsel %vm46_vm0, %v592_v62, -inf  ;;  %v591_v10 = vsel %vm511_vm9, -1e+30, %v240_v55  ;;  %v438_v56 = vpop.permute.xlu0 %437 }
 0x195   :  { %547 = vmin.xlane.f32.xlu1 %v546_v57  ;;  %v543_v63 = vsel %vm46_vm0, %v527_v60, inf  ;;  %v607_v14 = vsel %vm46_vm0, %v591_v10, -inf  ;;  %v599_v16 = vsel %vm519_vm10, -1e+30, %v369_v51  ;;  %v477_v55 = vpop.permute.xlu1 %476  ;;  %vm517_vm9 = vcmp.eq.f32.partialorder %v438_v56, %v1342_v48 }
 0x196   :  { %v631_v21 = vsel %vm46_vm0, %v599_v16, -inf  ;;  %vm526_vm5 = vcmp.eq.f32.partialorder %v477_v55, %v1338_v47  ;;  %vm933_vm10 = vcmask 195712  }
 0x197   :  { %544 = vmin.xlane.f32.xlu0 %v543_v63 }
 0x198   :  { %v1137_v2 = vpop.f32.mrb[2].mxu1  ;;  %v442_v3 = vpop.permute.xlu0 %441 }
 0x199   :  { %611 = vmax.xlane.f32.xlu1 %v610_v1  ;;  %v379_v4 = vpop.f32.mrb[3].mxu1  ;;  %v538_v9 = vsel %vm522_vm11, %v1137_v2, 1e+30  ;;  %v602_v15 = vsel %vm522_vm11, -1e+30, %v1137_v2  ;;  %vm518_vm7 = vcmp.eq.f32.partialorder %v442_v3, %v1342_v48  ;;  %vm940_vm11 = vcmask 261312  }
 0x19a   :  { %v1117_v6 = vpop.f32.mrb[2].mxu0  ;;  %v576_v13 = vsel %vm46_vm0, %v538_v9, inf  ;;  %v640_v20 = vsel %vm46_vm0, %v602_v15, -inf  ;;  %v537_v23 = vsel %vm521_vm13, %v379_v4, 1e+30 }
 0x19b   :  { %568 = vmin.xlane.f32.xlu0 %v567_v5  ;;  %v250_v8 = vpop.f32.mrb[3].mxu0  ;;  %v530_v25 = vsel %vm514_vm12, %v1117_v6, 1e+30  ;;  %v573_v27 = vsel %vm46_vm0, %v537_v23, inf  ;;  %v594_v30 = vsel %vm514_vm12, -1e+30, %v1117_v6 }
 0x19c   :  { %v552_v28 = vsel %vm46_vm0, %v530_v25, inf  ;;  %v601_v34 = vsel %vm521_vm13, -1e+30, %v379_v4  ;;  %v616_v36 = vsel %vm46_vm0, %v594_v30, -inf  ;;  %v529_v39 = vsel %vm513_vm14, %v250_v8, 1e+30 }
 0x19d   :  { %635 = vmax.xlane.f32.xlu1 %v634_v11  ;;  %v637_v41 = vsel %vm46_vm0, %v601_v34, -inf  ;;  %v549_v44 = vsel %vm46_vm0, %v529_v39, inf  ;;  %v593_v46 = vsel %vm513_vm14, -1e+30, %v250_v8  ;;  %vm947_vm12 = vcmask 326912  }
 0x19e   :  { %v613_v52 = vsel %vm46_vm0, %v593_v46, -inf  ;;  %vm954_vm13 = vcmask 392512   ;;  %vm961_vm14 = vcmask 458112  }
 0x19f   :  { %608 = vmax.xlane.f32.xlu0 %v607_v14 }
 0x1a0   :  { %v1140_v17 = vpop.f32.mrb[4].mxu1 }
 0x1a1   :  { %577 = vmin.xlane.f32.xlu1 %v576_v13  ;;  %v389_v19 = vpop.f32.mrb[5].mxu1  ;;  %v540_v38 = vsel %vm524_vm15, %v1140_v17, 1e+30  ;;  %v604_v45 = vsel %vm524_vm15, -1e+30, %v1140_v17  ;;  %vm968_vm15 = vcmask 523712  }
 0x1a2   :  { %v1120_v22 = vpop.f32.mrb[4].mxu0  ;;  %v582_v43 = vsel %vm46_vm0, %v540_v38, inf  ;;  %v646_v51 = vsel %vm46_vm0, %v604_v45, -inf  ;;  %v539_v42 = vsel %vm523_vm3, %v389_v19, 1e+30 }
 0x1a3   :  { %632 = vmax.xlane.f32.xlu0 %v631_v21  ;;  %v260_v26 = vpop.f32.mrb[5].mxu0  ;;  %v532_v53 = vsel %vm516_vm1, %v1120_v22, 1e+30  ;;  %v596_v57 = vsel %vm516_vm1, -1e+30, %v1120_v22  ;;  %v579_v60 = vsel %vm46_vm0, %v539_v42, inf  ;;  %v755_v21 = vpop.permute.xlu0 %754 }
 0x1a4   :  { %v558_v54 = vsel %vm46_vm0, %v532_v53, inf  ;;  %v603_v62 = vsel %vm523_vm3, -1e+30, %v389_v19  ;;  %v622_v63 = vsel %vm46_vm0, %v596_v57, -inf  ;;  %v531_v1 = vsel %vm515_vm4, %v260_v26, 1e+30  ;;  %v759_v19 = vpop.permute.xlu1 %758 }
 0x1a5   :  { %641 = vmax.xlane.f32.xlu1 %v640_v20  ;;  %v643_v2 = vsel %vm46_vm0, %v603_v62, -inf  ;;  %v555_v5 = vsel %vm46_vm0, %v531_v1, inf  ;;  %v595_v7 = vsel %vm515_vm4, -1e+30, %v260_v26  ;;  %vm1009_vm1 = vcmask 1041409  }
 0x1a6   :  { %v619_v10 = vsel %vm46_vm0, %v595_v7, -inf  ;;  %vm1019_vm3 = vcmask 1024  }
 0x1a7   :  { %553 = vmin.xlane.f32.xlu0 %v552_v28  ;;  %v1461_v23 = vpop.permute.xlu0 %762 }
 0x1a8   :  { %v1143_v33 = vpop.f32.mrb[6].mxu1  ;;  %v790_v20 = vpop.permute.xlu1 %789 }
 0x1a9   :  { %574 = vmin.xlane.f32.xlu1 %v573_v27  ;;  %v1396_v35 = vpop.f32.mrb[7].mxu1  ;;  %v542_v0 = vsel %vm526_vm5, %v1143_v33, 1e+30  ;;  %v606_v6 = vsel %vm526_vm5, -1e+30, %v1143_v33 }
 0x1aa   :  { %v1123_v37 = vpop.f32.mrb[6].mxu0  ;;  %v588_v4 = vsel %vm46_vm0, %v542_v0, inf  ;;  %v652_v9 = vsel %vm46_vm0, %v606_v6, -inf  ;;  %v541_v12 = vsel %vm525_vm8, %v1396_v35, 1e+30 }
 0x1ab   :  { %617 = vmax.xlane.f32.xlu0 %v616_v36  ;;  %v1404_v40 = vpop.f32.mrb[7].mxu0  ;;  %v534_v8 = vsel %vm518_vm7, %v1123_v37, 1e+30  ;;  %v598_v61 = vsel %vm518_vm7, -1e+30, %v1123_v37  ;;  %v585_v13 = vsel %vm46_vm0, %v541_v12, inf  ;;  %v1465_v26 = vpop.permute.xlu0 %766 }
 0x1ac   :  { %v564_v11 = vsel %vm46_vm0, %v534_v8, inf  ;;  %v605_v47 = vsel %vm525_vm8, -1e+30, %v1396_v35  ;;  %v628_v14 = vsel %vm46_vm0, %v598_v61, -inf  ;;  %v533_v15 = vsel %vm517_vm9, %v1404_v40, 1e+30  ;;  %v794_v22 = vpop.permute.xlu1 %793 }
 0x1ad   :  { %638 = vmax.xlane.f32.xlu1 %v637_v41  ;;  %v649_v16 = vsel %vm46_vm0, %v605_v47, -inf  ;;  %v561_v17 = vsel %vm46_vm0, %v533_v15, inf  ;;  %v597_v18 = vsel %vm517_vm9, -1e+30, %v1404_v40 }
 0x1ae   :  { %v625_v48 = vsel %vm46_vm0, %v597_v18, -inf  ;;  %vm926_vm0 = vcmask 130112  }
 0x1af   :  { %550 = vmin.xlane.f32.xlu0 %v549_v44  ;;  %v1467_v28 = vpop.permute.xlu0 %770 }
 0x1b0   :  { %v1463_v25 = vpop.permute.xlu1 %797 }
 0x1b1   :  { %583 = vmin.xlane.f32.xlu1 %v582_v43 }
 0x1b3   :  { %614 = vmax.xlane.f32.xlu0 %v613_v52  ;;  %v1471_v30 = vpop.permute.xlu0 %774 }
 0x1b4   :  { %v802_v27 = vpop.permute.xlu1 %801 }
 0x1b5   :  { %647 = vmax.xlane.f32.xlu1 %v646_v51 }
 0x1b7   :  { %559 = vmin.xlane.f32.xlu0 %v558_v54 }
 0x1b8   :  { %v1469_v29 = vpop.permute.xlu1 %805 }
 0x1b9   :  { %580 = vmin.xlane.f32.xlu1 %v579_v60 }
 0x1bb   :  { %623 = vmax.xlane.f32.xlu0 %v622_v63 }
 0x1bd   :  { %644 = vmax.xlane.f32.xlu1 %v643_v2 }
 0x1bf   :  { %556 = vmin.xlane.f32.xlu0 %v555_v5 }
 0x1c1   :  { %589 = vmin.xlane.f32.xlu1 %v588_v4 }
 0x1c3   :  { %620 = vmax.xlane.f32.xlu0 %v619_v10 }
 0x1c5   :  { %653 = vmax.xlane.f32.xlu1 %v652_v9 }
 0x1c7   :  { %565 = vmin.xlane.f32.xlu0 %v564_v11 }
 0x1c9   :  { %586 = vmin.xlane.f32.xlu1 %v585_v13 }
 0x1cb   :  { %629 = vmax.xlane.f32.xlu0 %v628_v14 }
 0x1cd   :  { %650 = vmax.xlane.f32.xlu1 %v649_v16 }
 0x1cf   :  { %562 = vmin.xlane.f32.xlu0 %v561_v17 }
 0x1d3   :  { %626 = vmax.xlane.f32.xlu0 %v625_v48 }
 0x1de   :  { %817 = vbcast.lane.b32.xlu1 %v1315_v32, 312  ;;  %v1473_v32 = vpop.permute.xlu1 %809 }
 0x1e2   :  { %v1477_v33 = vpop.permute.xlu1 %813 }
 0x1e9   :  { %782 = vbcast.lane.b32.xlu0 %v1311_v31, 312  ;;  %v1475_v31 = vpop.permute.xlu0 %778 }
 0x220   :  { %v572_v34 = vpop.xlane.xlu0 %571 }
 0x221   :  { %v677_v41 = vsub.f32 0.9, %v572_v34 }
 0x222   :  { %v548_v35 = vpop.xlane.xlu1 %547 }
 0x223   :  { %v669_v37 = vsub.f32 0.9, %v548_v35  ;;  %v693_v52 = vmax.f32 %v677_v41, 0.0 }
 0x224   :  { %v545_v36 = vpop.xlane.xlu0 %544 }
 0x225   :  { %v685_v43 = vmax.f32 %v669_v37, 0.0  ;;  %v668_v49 = vsub.f32 0.9, %v545_v36 }
 0x226   :  { %v612_v38 = vpop.xlane.xlu1 %611 }
 0x227   :  { %v1065_v39 = vadd.f32 -0.1, %v612_v38  ;;  %v684_v57 = vmax.f32 %v668_v49, 0.0 }
 0x228   :  { %v569_v40 = vpop.xlane.xlu0 %568 }
 0x229   :  { %v717_v44 = vmax.f32 %v1065_v39, 0.0  ;;  %v676_v55 = vsub.f32 0.9, %v569_v40 }
 0x22a   :  { %v636_v45 = vpop.xlane.xlu1 %635 }
 0x22b   :  { %v733_v46 = vadd.f32 %v717_v44, %v685_v43  ;;  %v1073_v50 = vadd.f32 -0.1, %v636_v45  ;;  %v692_v4 = vmax.f32 %v676_v55, 0.0 }
 0x22c   :  { %v609_v51 = vpop.xlane.xlu0 %608 }
 0x22d   :  { %v725_v53 = vmax.f32 %v1073_v50, 0.0  ;;  %v1064_v42 = vadd.f32 -0.1, %v609_v51  ;;  %v836_v54 = vmul.f32 %v759_v19, %v733_v46 }
 0x22e   :  { %v578_v56 = vpop.xlane.xlu1 %577 }
 0x22f   :  { %v741_v60 = vadd.f32 %v725_v53, %v693_v52  ;;  %v679_v62 = vsub.f32 0.9, %v578_v56  ;;  %v716_v63 = vmax.f32 %v1064_v42, 0.0  ;;  %871 = vperm.xlu1 %1169, %v836_v54  }
 0x230   :  { %v633_v0 = vpop.xlane.xlu0 %632 }
 0x231   :  { %v732_v1 = vadd.f32 %v716_v63, %v684_v57  ;;  %v1072_v2 = vadd.f32 -0.1, %v633_v0  ;;  %v844_v3 = vmul.f32 %v794_v22, %v741_v60  ;;  %v695_v6 = vmax.f32 %v679_v62, 0.0 }
 0x232   :  { %v642_v5 = vpop.xlane.xlu1 %641 }
 0x233   :  { %v1075_v7 = vadd.f32 -0.1, %v642_v5  ;;  %v724_v8 = vmax.f32 %v1072_v2, 0.0  ;;  %895 = vperm.xlu0 %1170, %v844_v3   ;;  %v835_v9 = vmul.f32 %v755_v21, %v732_v1 }
 0x234   :  { %v554_v10 = vpop.xlane.xlu0 %553 }
 0x235   :  { %v727_v11 = vmax.f32 %v1075_v7, 0.0  ;;  %v740_v12 = vadd.f32 %v724_v8, %v692_v4  ;;  %v671_v47 = vsub.f32 0.9, %v554_v10 }
 0x236   :  { %v575_v61 = vpop.xlane.xlu1 %574 }
 0x237   :  { %v743_v13 = vadd.f32 %v727_v11, %v695_v6  ;;  %868 = vperm.xlu0 %1170, %v835_v9   ;;  %v843_v14 = vmul.f32 %v790_v20, %v740_v12  ;;  %v678_v16 = vsub.f32 0.9, %v575_v61  ;;  %v687_v19 = vmax.f32 %v671_v47, 0.0 }
 0x238   :  { %v618_v15 = vpop.xlane.xlu0 %617 }
 0x239   :  { %v1067_v17 = vadd.f32 -0.1, %v618_v15  ;;  %892 = vperm.xlu1 %1169, %v843_v14   ;;  %v846_v18 = vmul.f32 %v802_v27, %v743_v13  ;;  %v694_v21 = vmax.f32 %v678_v16, 0.0 }
 0x23a   :  { %v639_v48 = vpop.xlane.xlu1 %638 }
 0x23b   :  { %v1074_v22 = vadd.f32 -0.1, %v639_v48  ;;  %v719_v34 = vmax.f32 %v1067_v17, 0.0  ;;  %901 = vperm.xlu0 %1170, %v846_v18  }
 0x23c   :  { %v551_v35 = vpop.xlane.xlu0 %550 }
 0x23d   :  { %v726_v36 = vmax.f32 %v1074_v22, 0.0  ;;  %v735_v37 = vadd.f32 %v719_v34, %v687_v19  ;;  %v670_v41 = vsub.f32 0.9, %v551_v35 }
 0x23e   :  { %v584_v38 = vpop.xlane.xlu1 %583 }
 0x23f   :  { %v742_v39 = vadd.f32 %v726_v36, %v694_v21  ;;  %v681_v40 = vsub.f32 0.9, %v584_v38  ;;  %v838_v20 = vmul.f32 %v1465_v26, %v735_v37  ;;  %v686_v49 = vmax.f32 %v670_v41, 0.0 }
 0x240   :  { %v615_v43 = vpop.xlane.xlu0 %614 }
 0x241   :  { %v1066_v44 = vadd.f32 -0.1, %v615_v43  ;;  %877 = vperm.xlu1 %1169, %v838_v20   ;;  %v845_v27 = vmul.f32 %v1463_v25, %v742_v39  ;;  %v697_v46 = vmax.f32 %v681_v40, 0.0 }
 0x242   :  { %v648_v45 = vpop.xlane.xlu1 %647 }
 0x243   :  { %v1077_v50 = vadd.f32 -0.1, %v648_v45  ;;  %v718_v51 = vmax.f32 %v1066_v44, 0.0  ;;  %898 = vperm.xlu0 %1170, %v845_v27  }
 0x244   :  { %v560_v52 = vpop.xlane.xlu0 %559 }
 0x245   :  { %v729_v53 = vmax.f32 %v1077_v50, 0.0  ;;  %v734_v42 = vadd.f32 %v718_v51, %v686_v49  ;;  %v673_v56 = vsub.f32 0.9, %v560_v52 }
 0x246   :  { %v581_v54 = vpop.xlane.xlu1 %580 }
 0x247   :  { %v745_v55 = vadd.f32 %v729_v53, %v697_v46  ;;  %v837_v57 = vmul.f32 %v1461_v23, %v734_v42  ;;  %v680_v60 = vsub.f32 0.9, %v581_v54  ;;  %v689_v0 = vmax.f32 %v673_v56, 0.0 }
 0x248   :  { %v624_v26 = vpop.xlane.xlu0 %623 }
 0x249   :  { %v1069_v62 = vadd.f32 -0.1, %v624_v26  ;;  %874 = vperm.xlu1 %1169, %v837_v57   ;;  %v848_v25 = vmul.f32 %v1473_v32, %v745_v55  ;;  %v696_v4 = vmax.f32 %v680_v60, 0.0 }
 0x24a   :  { %v645_v63 = vpop.xlane.xlu1 %644 }
 0x24b   :  { %v1076_v1 = vadd.f32 -0.1, %v645_v63  ;;  %v721_v2 = vmax.f32 %v1069_v62, 0.0  ;;  %907 = vperm.xlu0 %1170, %v848_v25   ;;  %v916_v62 = vand.u32 127, %v408_v58 }
 0x24c   :  { %v557_v3 = vpop.xlane.xlu0 %556 }
 0x24d   :  { %v728_v5 = vmax.f32 %v1076_v1, 0.0  ;;  %v737_v6 = vadd.f32 %v721_v2, %v689_v0  ;;  %v672_v23 = vsub.f32 0.9, %v557_v3  ;;  %v928_v63 = vadd.s32 4294967280, %v916_v62 }
 0x24e   :  { %v590_v7 = vpop.xlane.xlu1 %589  ;;  %v921_v1 = vadd.s32 4294967288, %v916_v62  ;;  %v935_v3 = vadd.s32 4294967272, %v916_v62  ;;  %v956_v58 = vadd.s32 4294967248, %v916_v62 }
 0x24f   :  { %v744_v8 = vadd.f32 %v728_v5, %v696_v4  ;;  %v840_v9 = vmul.f32 %v1471_v30, %v737_v6  ;;  %v688_v61 = vmax.f32 %v672_v23, 0.0  ;;  %v683_v30 = vsub.f32 0.9, %v590_v7 }
 0x250   :  { %v621_v10 = vpop.xlane.xlu0 %620  ;;  %v931_v4 = vsub.s32 %v928_v63, %v1270_v59  ;;  %v942_v5 = vadd.s32 4294967264, %v916_v62  ;;  %v924_v7 = vsub.s32 %v921_v1, %v1270_v59 }
 0x251   :  { %v1068_v11 = vadd.f32 -0.1, %v621_v10  ;;  %883 = vperm.xlu1 %1169, %v840_v9   ;;  %v847_v12 = vmul.f32 %v1469_v29, %v744_v8  ;;  %v699_v29 = vmax.f32 %v683_v30, 0.0  ;;  %v949_v10 = vadd.s32 4294967256, %v916_v62 }
 0x252   :  { %v654_v32 = vpop.xlane.xlu1 %653  ;;  %v959_v30 = vsub.s32 %v956_v58, %v1270_v59 }
 0x253   :  { %v720_v13 = vmax.f32 %v1068_v11, 0.0  ;;  %904 = vperm.xlu0 %1170, %v847_v12   ;;  %v1079_v19 = vadd.f32 -0.1, %v654_v32  ;;  %v938_v11 = vsub.s32 %v935_v3, %v1270_v59 }
 0x254   :  { %v566_v47 = vpop.xlane.xlu0 %565 }
 0x255   :  { %v736_v14 = vadd.f32 %v720_v13, %v688_v61  ;;  %v731_v36 = vmax.f32 %v1079_v19, 0.0  ;;  %v675_v43 = vsub.f32 0.9, %v566_v47  ;;  %v945_v61 = vsub.s32 %v942_v5, %v1270_v59 }
 0x256   :  { %v587_v15 = vpop.xlane.xlu1 %586 }
 0x257   :  { %v839_v16 = vmul.f32 %v1467_v28, %v736_v14  ;;  %v682_v18 = vsub.f32 0.9, %v587_v15  ;;  %v747_v44 = vadd.f32 %v731_v36, %v699_v29  ;;  %v691_v51 = vmax.f32 %v675_v43, 0.0 }
 0x258   :  { %v630_v17 = vpop.xlane.xlu0 %629 }
 0x259   :  { %880 = vperm.xlu1 %1169, %v839_v16   ;;  %v698_v35 = vmax.f32 %v682_v18, 0.0  ;;  %v1071_v40 = vadd.f32 -0.1, %v630_v17  ;;  %v963_v16 = vadd.s32 4294967240, %v916_v62 }
 0x25a   :  { %v651_v48 = vpop.xlane.xlu1 %650 }
 0x25b   :  { %v1078_v22 = vadd.f32 -0.1, %v651_v48  ;;  %v723_v46 = vmax.f32 %v1071_v40, 0.0  ;;  %v952_v48 = vsub.s32 %v949_v10, %v1270_v59  ;;  %v966_v36 = vsub.s32 %v963_v16, %v1270_v59 }
 0x25c   :  { %v563_v34 = vpop.xlane.xlu0 %562 }
 0x25d   :  { %v730_v21 = vmax.f32 %v1078_v22, 0.0  ;;  %v674_v38 = vsub.f32 0.9, %v563_v34  ;;  %v739_v42 = vadd.f32 %v723_v46, %v691_v51 }
 0x25e   :  { %v818_v28 = vpop.permute.xlu1 %817 }
 0x25f   :  { %v746_v37 = vadd.f32 %v730_v21, %v698_v35  ;;  %v690_v27 = vmax.f32 %v674_v38, 0.0  ;;  %v850_v49 = vmul.f32 %v818_v28, %v747_v44 }
 0x260   :  { %v627_v39 = vpop.xlane.xlu0 %626 }
 0x261   :  { %v1070_v41 = vadd.f32 -0.1, %v627_v39  ;;  %v849_v20 = vmul.f32 %v1477_v33, %v746_v37 }
 0x263   :  { %v722_v45 = vmax.f32 %v1070_v41, 0.0  ;;  %910 = vperm.xlu0 %1170, %v849_v20  }
 0x264   :  { %v783_v53 = vpop.permute.xlu0 %782 }
 0x265   :  { %v738_v50 = vadd.f32 %v722_v45, %v690_v27  ;;  %v842_v54 = vmul.f32 %v783_v53, %v739_v42 }
 0x267   :  { %v841_v52 = vmul.f32 %v1475_v31, %v738_v50  ;;  %913 = vperm.xlu0 %1170, %v850_v49   ;;  %v919_v31 = vsub.s32 %v916_v62, %v1270_v59 }
 0x269   :  { %886 = vperm.xlu1 %1169, %v841_v52  }
 0x26d   :  { %889 = vperm.xlu1 %1169, %v842_v54  }
 0x2ae   :  { %v872_v56 = vpop.permute.xlu1 %871 }
 0x2af   :  { %v925_v47 = vrot.slane %v872_v56, %v924_v7 }
 0x2b2   :  { %v896_v55 = vpop.permute.xlu0 %895 }
 0x2b3   :  { %v977_v14 = vrot.slane %v896_v55, %v924_v7 }
 0x2b6   :  { %v869_v33 = vpop.permute.xlu0 %868 }
 0x2b7   :  { %v920_v9 = vrot.slane %v869_v33, %v919_v31 }
 0x2b8   :  { %v893_v26 = vpop.permute.xlu1 %892 }
 0x2b9   :  { %v973_v23 = vrot.slane %v893_v26, %v919_v31  ;;  %v927_v17 = vsel %vm926_vm0, %v925_v47, %v920_v9 }
 0x2ba   :  { %v902_v57 = vpop.permute.xlu0 %901 }
 0x2bb   :  { %v978_v18 = vsel %vm926_vm0, %v977_v14, %v973_v23  ;;  %v987_v21 = vrot.slane %v902_v57, %v938_v11 }
 0x2c0   :  { %v878_v25 = vpop.permute.xlu1 %877 }
 0x2c1   :  { %v939_v29 = vrot.slane %v878_v25, %v938_v11 }
 0x2c2   :  { %v899_v60 = vpop.permute.xlu0 %898 }
 0x2c3   :  { %v982_v12 = vrot.slane %v899_v60, %v931_v4 }
 0x2c5   :  { %v983_v19 = vsel %vm933_vm10, %v982_v12, %v978_v18 }
 0x2c6   :  { %v988_v39 = vsel %vm940_vm11, %v987_v21, %v983_v19 }
 0x2c8   :  { %v875_v2 = vpop.permute.xlu1 %874 }
 0x2c9   :  { %v932_v32 = vrot.slane %v875_v2, %v931_v4 }
 0x2ca   :  { %v908_v0 = vpop.permute.xlu0 %907 }
 0x2cb   :  { %v934_v22 = vsel %vm933_vm10, %v932_v32, %v927_v17  ;;  %v997_v44 = vrot.slane %v908_v0, %v952_v48 }
 0x2cc   :  { %v941_v40 = vsel %vm940_vm11, %v939_v29, %v934_v22 }
 0x2d0   :  { %v884_v8 = vpop.permute.xlu1 %883 }
 0x2d1   :  { %v953_v27 = vrot.slane %v884_v8, %v952_v48 }
 0x2d2   :  { %v905_v6 = vpop.permute.xlu0 %904 }
 0x2d3   :  { %v992_v34 = vrot.slane %v905_v6, %v945_v61 }
 0x2d5   :  { %v993_v41 = vsel %vm947_vm12, %v992_v34, %v988_v39 }
 0x2d6   :  { %v998_v49 = vsel %vm954_vm13, %v997_v44, %v993_v41 }
 0x2d8   :  { %v881_v15 = vpop.permute.xlu1 %880 }
 0x2d9   :  { %v946_v35 = vrot.slane %v881_v15, %v945_v61 }
 0x2db   :  { %v948_v20 = vsel %vm947_vm12, %v946_v35, %v941_v40 }
 0x2dc   :  { %v955_v50 = vsel %vm954_vm13, %v953_v27, %v948_v20 }
 0x2e2   :  { %v911_v13 = vpop.permute.xlu0 %910 }
 0x2e3   :  { %v1002_v28 = vrot.slane %v911_v13, %v959_v30 }
 0x2e5   :  { %v1003_v51 = vsel %vm961_vm14, %v1002_v28, %v998_v49 }
 0x2e6   :  { %v914_v37 = vpop.permute.xlu0 %913 }
 0x2e7   :  { %v1007_v45 = vrot.slane %v914_v37, %v966_v36 }
 0x2e8   :  { %v887_v38 = vpop.permute.xlu1 %886 }
 0x2e9   :  { %v960_v43 = vrot.slane %v887_v38, %v959_v30  ;;  %v1008_v42 = vsel %vm968_vm15, %v1007_v45, %v1003_v51 }
 0x2eb   :  { %v962_v52 = vsel %vm961_vm14, %v960_v43, %v955_v50 }
 0x2ec   :  { %v890_v46 = vpop.permute.xlu1 %889 }
 0x2ed   :  { %v967_v59 = vrot.slane %v890_v46, %v966_v36 }
 0x2ef   :  { %v969_v53 = vsel %vm968_vm15, %v967_v59, %v962_v52 }
 0x2f0   :  { %v1010_v54 = vsel %vm1009_vm1, %v1008_v42, %v969_v53 }
 0x2f1   :  { %v1012_v55 = vsel %vm655_vm2, %v1010_v54, 0.0 }
 0x2f2   :  { %1013 = vadd.xlane.f32.xlu1 %v1012_v55 }
 0x37f   :  { %v1014_v33 = vpop.xlane.xlu1 %1013 }
 0x380   :  { %v1018_v56 = vsel %vm1304_vm6, %v1014_v33, 0.0 }
 0x381   :  { %v1020_v57 = vsel %vm1019_vm3, %v1018_v56, 0.0 }
 0x382   :  { %1021 = vadd.xlane.f32.xlu0 %v1020_v57 }
 0x40f   :  { %v1022_v26 = vpop.xlane.xlu0 %1021 }
 0x410   :  { %v1023_v60 = vrot.slane %v1022_v26, 4 }
 0x412   :  { %v1024_v62 = vadd.f32 %v1023_v60, %v1022_v26 }
 0x414   :  { %v1025_v25 = vrot.slane %v1024_v62, 2 }
 0x416   :  { %v1026_v63 = vadd.f32 %v1025_v25, %v1024_v62 }
 0x418   :  { %v1027_v0 = vrot.slane %v1026_v63, 1 }
 0x41a   :  { %v1028_v1 = vadd.f32 %v1027_v0, %v1026_v63 }
 0x41c   :  { %1160 = vpush %v1028_v1 }
 0x44d   :  { %s1161_s25 = spop %1160 }
 0x44e   :  { %v1030_v2 = vstv %s1161_s25 }
 0x44f   :  { %1031 = vst [vmem:[#allocation5] sm:$0xff] %v1030_v2 }
 0x450   :  { %1212 = shalt.err (!%p1209_p12)
}
 0x451   :  { %s1213_s29 = scalar_lea.hbm %s1518_s2, 128 }
 0x452   :  { %p1214_p13 = scmp.ne.s32.totalorder %s1518_s2, %s1213_s29  ;;  %p1217_p0 = scmp.lt.u32.totalorder %s1213_s29, %s1518_s2 }
 0x454   :  { %p1219_p1 = pnand %p1217_p0, %p1214_p13 }
 0x456   :  { %1222 = shalt.err (!%p1219_p1)
}
 0x457   :  { %1041 = dma.vmem_to_hbm [thread:$0]  %s1039_s24, 128, %s1518_s2, [#allocation4]  }
 0x458   :  { %1225 = dma.done.wait [#allocation4], 128  }
 0x459   :  { %1226 = vsyncadd [#allocation4], 4294967168 }
 0x45a   :  { %1045 = vsyncpa [#allocation3], 1 }
 0x45b   :  { %1046 = vsyncpa [#allocation4], 1 }

</bundles_post_ra>
